<compile_context>
chip_gen: v7x
topology: tpu7x:2x2x1
jax: 0.10.0
libtpu: 0.0.40
codegen_flags: <defaults>
</compile_context>

<pallas_src>
import jax
import jax.numpy as jnp
from jax.experimental import pallas as pl
from jax.experimental.pallas import tpu as pltpu

_EPS = 1e-12  # F.normalize default eps


def _contrast_loss_kernel(f1_ref, f2_ref, partial_ref):
    """One batch tile: accumulate sum over rows of ||f1n - f2n||^2.

    f1_ref: (TILE_B, V, D)   features_1 rows grouped per batch element
    f2_ref: (TILE_B, 1, D)   features_2 rows (broadcast over V in-register)
    partial_ref: (1, 1, 1)   per-split f32 accumulator (VMEM-resident output)
    """
    j = pl.program_id(1)

    @pl.when(j == 0)
    def _init():
        partial_ref[...] = jnp.zeros_like(partial_ref)

    f1 = f1_ref[...].astype(jnp.float32)            # (TB, V, D)
    f2 = f2_ref[...].astype(jnp.float32)            # (TB, 1, D)

    # Per-row reductions over the lane (feature) axis.
    s11 = jnp.sum(f1 * f1, axis=-1)                 # (TB, V)
    s22 = jnp.sum(f2 * f2, axis=-1)                 # (TB, 1)
    s12 = jnp.sum(f1 * f2, axis=-1)                 # (TB, V)  f2 broadcast over V

    # F.normalize(p=2, eps=1e-12): x / max(||x||, eps)
    inv1 = 1.0 / jnp.maximum(jnp.sqrt(s11), _EPS)   # (TB, V)
    inv2 = 1.0 / jnp.maximum(jnp.sqrt(s22), _EPS)   # (TB, 1)

    # ||f1n - f2n||^2 per row; zero-padded rows contribute exactly 0.
    contrib = (s11 * inv1 * inv1
               + s22 * inv2 * inv2
               - 2.0 * (s12 * inv1) * inv2)         # (TB, V)

    partial_ref[...] += jnp.sum(contrib)

    # NOTE: no work at j == last beyond the normal accumulate; the final
    # sqrt / 0.05 scaling is a single scalar op done in the wrapper.


def _pick_tile_b(B, view_num, D, itemsize, num_splits,
                 vmem_budget_bytes=20 * 1024 * 1024, max_tile_b=1024):
    """Largest batch tile whose double-buffered blocks fit the VMEM budget.

    Accounts for sublane padding to 8 and lane padding to 128 (the (8,128)
    vreg tile), so the estimate is valid on v5e/v6e (and conservative for the
    64 MiB-VMEM v7x, where the 32 MiB scoped limit below still holds).
    """
    pad_v = -(-view_num // 8) * 8          # f1 sublane rows per batch element
    pad_d = -(-D // 128) * 128             # lane padding
    bytes_per_b = (pad_v + 8) * pad_d * itemsize   # f1 block + f2 block rows
    fit = max(1, vmem_budget_bytes // (2 * bytes_per_b))  # 2 pipeline buffers
    return int(max(1, min(max_tile_b, fit, pl.cdiv(B, num_splits))))


def contrast_loss(features_1, features_2, view_num, *, tile_b=None, num_splits=2):
    """features_1: (B*view_num, D); features_2: (B, D). Returns scalar loss."""
    N, D = features_1.shape
    B, D2 = features_2.shape
    assert D == D2 and N == B * view_num, (features_1.shape, features_2.shape, view_num)

    # Free, contiguous views -- no repeat_interleave copy in HBM.
    f1 = features_1.reshape(B, view_num, D)
    f2 = features_2.reshape(B, 1, D)

    num_splits = max(1, int(num_splits))
    if tile_b is None:
        tile_b = _pick_tile_b(B, view_num, D, features_1.dtype.itemsize, num_splits)
    else:
        tile_b = int(max(1, min(int(tile_b), pl.cdiv(B, num_splits))))

    tiles_per_split = int(pl.cdiv(B, num_splits * tile_b))
    b_padded = num_splits * tiles_per_split * tile_b
    if b_padded != B:
        # Zero rows contribute exactly 0 (0 * (1/eps)^2 == 0); only hit when
        # B is not a multiple of num_splits * tile_b.
        pad = b_padded - B
        f1 = jnp.pad(f1, ((0, pad), (0, 0), (0, 0)))
        f2 = jnp.pad(f2, ((0, pad), (0, 0), (0, 0)))

    in_bytes = (features_1.size * features_1.dtype.itemsize
                + features_2.size * features_2.dtype.itemsize)

    partials = pl.pallas_call(
        _contrast_loss_kernel,
        out_shape=jax.ShapeDtypeStruct((num_splits, 1, 1), jnp.float32),
        grid_spec=pltpu.PrefetchScalarGridSpec(
            num_scalar_prefetch=0,
            grid=(num_splits, tiles_per_split),
            in_specs=[
                # Last-two block dims equal the full array dims (V, D) / (1, D),
                # so the (8,128) BlockSpec constraint is satisfied for any D, V.
                pl.BlockSpec((tile_b, view_num, D),
                             lambda c, j: (c * tiles_per_split + j, 0, 0)),
                pl.BlockSpec((tile_b, 1, D),
                             lambda c, j: (c * tiles_per_split + j, 0, 0)),
            ],
            out_specs=pl.BlockSpec((1, 1, 1), lambda c, j: (c, 0, 0)),
        ),
        compiler_params=pltpu.CompilerParams(
            # v7x: the leading "parallel" axis is sharded across the 2 TCs;
            # on v5e/v6e it is just an outer sequential loop.
            dimension_semantics=("parallel", "arbitrary"),
            vmem_limit_bytes=32 * 1024 * 1024,
        ),
        cost_estimate=pl.CostEstimate(
            flops=int(8 * N * D),
            transcendentals=int(N + B),
            bytes_accessed=int(in_bytes + 4 * num_splits),
        ),
    )(f1, f2)

    # Combine per-split partial sums-of-squares; final Frobenius norm + scale.
    return 0.05 * jnp.sqrt(jnp.sum(partials))


def _reference(features_1, features_2, view_num):
    """Straightforward JAX port of the PyTorch module (for verification)."""
    f2 = jnp.repeat(features_2, view_num, axis=0)

    def norm(x):
        x = x.astype(jnp.float32)
        n = jnp.sqrt(jnp.sum(x * x, axis=1, keepdims=True))
        return x / jnp.maximum(n, _EPS)

    d = norm(features_1) - norm(f2)
    return 0.05 * jnp.sqrt(jnp.sum(d * d))


if __name__ == "__main__":
    key = jax.random.PRNGKey(0)
    k1, k2, k3, k4 = jax.random.split(key, 4)

    # Case 1: shapes implied by the module's typical use (small demo sizes).
    batch, view_num, hidden = 2, 2, 32
    features_1 = jax.random.normal(k1, (batch * view_num, hidden), dtype=jnp.float32)
    features_2 = jax.random.normal(k2, (batch, hidden), dtype=jnp.float32)

    loss = jax.block_until_ready(contrast_loss(features_1, features_2, view_num))
    ref = _reference(features_1, features_2, view_num)
    assert jnp.allclose(loss, ref, rtol=5e-5, atol=1e-6), (loss, ref)

    # Case 2: exercises multi-tile accumulation, batch padding, non-128 D,
    # view_num=3, and the 2-way parallel split.
    batch2, view2, hidden2 = 13, 3, 160
    f1b = jax.random.normal(k3, (batch2 * view2, hidden2), dtype=jnp.float32)
    f2b = jax.random.normal(k4, (batch2, hidden2), dtype=jnp.float32)

    loss2 = jax.block_until_ready(
        contrast_loss(f1b, f2b, view2, tile_b=2, num_splits=2))
    ref2 = _reference(f1b, f2b, view2)
    assert jnp.allclose(loss2, ref2, rtol=1e-4, atol=1e-6), (loss2, ref2)

    print("KERNEL_OK")
</pallas_src>

<mosaic_0001>
module attributes {stable_mosaic.version = 11 : i64} {
  func.func @_contrast_loss_kernel(%arg0: i32, %arg1: i32, %arg2: memref<1x2x32xf32, #tpu.memory_space<vmem>>, %arg3: memref<1x1x32xf32, #tpu.memory_space<vmem>>, %arg4: memref<1x1x1xf32, #tpu.memory_space<vmem>>) attributes {dimension_semantics = [#tpu.dimension_semantics<parallel>, #tpu.dimension_semantics<arbitrary>], iteration_bounds = array<i64: 2, 1>, scalar_prefetch = 0 : i64, scratch_operands = 0 : i64, tpu.core_type = #tpu.core_type<tc>, window_params = [{transform_indices = @transform_0, window_bounds = array<i64: 1, 2, 32>}, {transform_indices = @transform_1, window_bounds = array<i64: 1, 1, 32>}, {transform_indices = @transform_2, window_bounds = array<i64: 1, 1, 1>}]} {
    %c0_i32 = arith.constant 0 : i32
    %0 = arith.cmpi eq, %arg1, %c0_i32 : i32
    %1 = arith.extui %0 : i1 to i32
    %c0_i32_0 = arith.constant 0 : i32
    %2 = arith.cmpi ne, %1, %c0_i32_0 : i32
    scf.if %2 {
      %cst_20 = arith.constant 0.000000e+00 : f32
      %42 = vector.broadcast %cst_20 : f32 to vector<1x1x1xf32>
      %c0_21 = arith.constant 0 : index
      %c0_22 = arith.constant 0 : index
      %c0_23 = arith.constant 0 : index
      %43 = vector.load %arg4[%c0_21, %c0_22, %c0_23] : memref<1x1x1xf32, #tpu.memory_space<vmem>>, vector<1x1x1xf32>
      tpu.vector_store %arg4[%c0_21, %c0_22, %c0_23], %42 {strides = array<i32>} : memref<1x1x1xf32, #tpu.memory_space<vmem>>, vector<1x1x1xf32>,
    } else {
    }
    %c0 = arith.constant 0 : index
    %c0_1 = arith.constant 0 : index
    %c0_2 = arith.constant 0 : index
    %3 = vector.load %arg2[%c0, %c0_1, %c0_2] : memref<1x2x32xf32, #tpu.memory_space<vmem>>, vector<1x2x32xf32>
    %c0_3 = arith.constant 0 : index
    %c0_4 = arith.constant 0 : index
    %c0_5 = arith.constant 0 : index
    %4 = vector.load %arg3[%c0_3, %c0_4, %c0_5] : memref<1x1x32xf32, #tpu.memory_space<vmem>>, vector<1x1x32xf32>
    %5 = arith.mulf %3, %3 : vector<1x2x32xf32>
    %cst = arith.constant dense<0.000000e+00> : vector<1x2xf32>
    %6 = vector.multi_reduction <add>, %5, %cst [2] : vector<1x2x32xf32> to vector<1x2xf32>
    %7 = arith.mulf %4, %4 : vector<1x1x32xf32>
    %cst_6 = arith.constant dense<0.000000e+00> : vector<1x1xf32>
    %8 = vector.multi_reduction <add>, %7, %cst_6 [2] : vector<1x1x32xf32> to vector<1x1xf32>
    %9 = vector.broadcast %4 : vector<1x1x32xf32> to vector<1x2x32xf32>
    %10 = arith.mulf %3, %9 : vector<1x2x32xf32>
    %cst_7 = arith.constant dense<0.000000e+00> : vector<1x2xf32>
    %11 = vector.multi_reduction <add>, %10, %cst_7 [2] : vector<1x2x32xf32> to vector<1x2xf32>
    %12 = math.sqrt %6 : vector<1x2xf32>
    %cst_8 = arith.constant 9.99999996E-13 : f32
    %13 = vector.broadcast %cst_8 : f32 to vector<1x2xf32>
    %14 = arith.maximumf %12, %13 : vector<1x2xf32>
    %cst_9 = arith.constant 1.000000e+00 : f32
    %15 = vector.broadcast %cst_9 : f32 to vector<1x2xf32>
    %16 = arith.divf %15, %14 : vector<1x2xf32>
    %17 = math.sqrt %8 : vector<1x1xf32>
    %cst_10 = arith.constant 9.99999996E-13 : f32
    %18 = vector.broadcast %cst_10 : f32 to vector<1x1xf32>
    %19 = arith.maximumf %17, %18 : vector<1x1xf32>
    %cst_11 = arith.constant 1.000000e+00 : f32
    %20 = vector.broadcast %cst_11 : f32 to vector<1x1xf32>
    %21 = arith.divf %20, %19 : vector<1x1xf32>
    %22 = arith.mulf %6, %16 : vector<1x2xf32>
    %23 = arith.mulf %22, %16 : vector<1x2xf32>
    %24 = arith.mulf %8, %21 : vector<1x1xf32>
    %25 = arith.mulf %24, %21 : vector<1x1xf32>
    %26 = vector.broadcast %25 : vector<1x1xf32> to vector<1x2xf32>
    %27 = arith.addf %23, %26 : vector<1x2xf32>
    %28 = arith.mulf %11, %16 : vector<1x2xf32>
    %cst_12 = arith.constant 2.000000e+00 : f32
    %29 = vector.broadcast %cst_12 : f32 to vector<1x2xf32>
    %30 = arith.mulf %29, %28 : vector<1x2xf32>
    %31 = vector.broadcast %21 : vector<1x1xf32> to vector<1x2xf32>
    %32 = arith.mulf %30, %31 : vector<1x2xf32>
    %33 = arith.subf %27, %32 : vector<1x2xf32>
    %c0_13 = arith.constant 0 : index
    %c0_14 = arith.constant 0 : index
    %c0_15 = arith.constant 0 : index
    %34 = vector.load %arg4[%c0_13, %c0_14, %c0_15] : memref<1x1x1xf32, #tpu.memory_space<vmem>>, vector<1x1x1xf32>
    %35 = vector.shape_cast %33 : vector<1x2xf32> to vector<1x1x2xf32>
    %cst_16 = arith.constant dense<0.000000e+00> : vector<1xf32>
    %36 = vector.multi_reduction <add>, %35, %cst_16 [1, 2] : vector<1x1x2xf32> to vector<1xf32>
    %37 = vector.shape_cast %36 : vector<1xf32> to vector<1x1x1xf32>
    %38 = vector.extract %37[0, 0, 0] : f32 from vector<1x1x1xf32>
    %39 = vector.broadcast %38 : f32 to vector<1x1x1xf32>
    %40 = arith.addf %34, %39 : vector<1x1x1xf32>
    %c0_17 = arith.constant 0 : index
    %c0_18 = arith.constant 0 : index
    %c0_19 = arith.constant 0 : index
    %41 = vector.load %arg4[%c0_17, %c0_18, %c0_19] : memref<1x1x1xf32, #tpu.memory_space<vmem>>, vector<1x1x1xf32>
    tpu.vector_store %arg4[%c0_17, %c0_18, %c0_19], %40 {strides = array<i32>} : memref<1x1x1xf32, #tpu.memory_space<vmem>>, vector<1x1x1xf32>,
    return
  }
  func.func @transform_0(%arg0: i32, %arg1: i32) -> (i32, i32, i32) {
    %c1_i32 = arith.constant 1 : i32
    %0 = arith.muli %arg0, %c1_i32 : i32
    %1 = arith.addi %0, %arg1 : i32
    %c0_i32 = arith.constant 0 : i32
    %c0_i32_0 = arith.constant 0 : i32
    %c0_i32_1 = arith.constant 0 : i32
    return %1, %c0_i32, %c0_i32_0 : i32, i32, i32
  }
  func.func @transform_1(%arg0: i32, %arg1: i32) -> (i32, i32, i32) {
    %c1_i32 = arith.constant 1 : i32
    %0 = arith.muli %arg0, %c1_i32 : i32
    %1 = arith.addi %0, %arg1 : i32
    %c0_i32 = arith.constant 0 : i32
    %c0_i32_0 = arith.constant 0 : i32
    %c0_i32_1 = arith.constant 0 : i32
    return %1, %c0_i32, %c0_i32_0 : i32, i32, i32
  }
  func.func @transform_2(%arg0: i32, %arg1: i32) -> (i32, i32, i32) {
    %c0_i32 = arith.constant 0 : i32
    %c0_i32_0 = arith.constant 0 : i32
    %c0_i32_1 = arith.constant 0 : i32
    return %arg0, %c0_i32, %c0_i32_0 : i32, i32, i32
  }
}

</mosaic_0001>

<bundles_post_ra>
// kernel: tpu_custom_call.1
= control target key start
LH: loop header
LB: loop body
LE: loop exit
PB: predicated region body
PF: predicated region fallthrough
CT: control target
= control target key end

     0   :  { %7 = vsyncpa [#allocation3], 0  ;;  %s678_s0 = inlined_call_operand.hbm [shape: f32[2,2,32], index: 0, kind: input, shape index: {}]   ;;  %s679_s1 = inlined_call_operand.vmem [shape: f32[2,1,32], index: 1, kind: input, shape index: {}]   ;;  %s680_s2 = inlined_call_operand.vmem [shape: f32[2,1,1], index: 2, kind: output, shape index: {}]  }
   0x1   :  { %9 = vsyncpa [#allocation3 + $0x1], 0  ;;  %s546_s9 = smov 0   ;;  %s548_s10 = smov 0  }
   0x2   :  { %s550_s11 = smov 0   ;;  %s552_s12 = smov 0  }
   0x3   :  { %s554_s13 = smov 0   ;;  %s556_s14 = smov 0  }
   0x4 LB: > { %s367_s15 = sadd.s32 4294967295, %s526_s14   ;;  %s27_s16 = sadd.s32 1, %s522_s13  ;;  %s526_s14 = sphi %s556_s14, %s15_s14   ;;  %s522_s13 = sphi %s554_s13, %s690_s13   ;;  %s518_s12 = sphi %s552_s12, %s689_s12   ;;  %s514_s11 = sphi %s550_s11, %s688_s11   ;;  %s510_s10 = sphi %s548_s10, %s687_s10   ;;  %s506_s9 = sphi %s546_s9, %s686_s9  }
   0x5   : > { %p29_p0 = scmp.ge.s32.totalorder %s27_s16, 2  ;;  %s36_s17 = sadd.s32 1, %s514_s11 }
   0x6   : > { %p43_p1 = scmp.ne.s32.totalorder %s514_s11, %s510_s10  ;;  %p44_p2 = scmp.eq.s32.totalorder %s526_s14, 0 }
   0x7   : > { %s692_s16 = smov (%p29_p0, %s27_s16), 0  ;;  %p49_p4 = scmp.ne.s32.totalorder %s510_s10, %s506_s9 }
   0x8   : > { %p582_p3 = por %p44_p2, %p43_p1  ;;  %s33_s19 = ssub.s32 %s522_s13, %s692_s16 }
   0x9   : > { %p50_p5 = scmp.eq.s32.totalorder %s367_s15, 0  ;;  %p34_p6 = scmp.eq.s32.totalorder %s33_s19, 0 }
   0xa   : > { %p385_p8 = scmp.lt.s32.totalorder %s526_s14, 2  ;;  %s127_s22 = sand.u32 1, %s514_s11  }
   0xb   : > { %p589_p7 = por %p50_p5, %p49_p4  ;;  %s372_s23 = sshll.u32 %s522_s13, 5 }
   0xc   : > { %s595_s21 = scalar_select %p34_p6, %s514_s11, %s36_s17  }
   0xd   : > { %s371_s24 = sshll.u32 %s127_s22, 1  ;;  %s602_s27 = scalar_lea.hbm %s678_s0, %s372_s23 }
   0xe   : > { %s131_s28 = scalar_lea.vmem [#allocation2], %s371_s24  ;;  %p606_p9 = pnand %p385_p8, %p582_p3 }
   0xf   : > { %s139_s29 = sshll.u32 %s131_s28, 4  ;;  %s128_s3 = scalar_lea.sflag [#allocation3], %s127_s22  ;;  %s610_s29 = int_to_ptr.vmem [resolvable:$true] %s139_s29 }
  0x10   : > { %s446_s4 = scalar_lea.hbm %s602_s27, 32  ;;  %p448_p13 = pneg %p606_p9 }
  0x11   : > { %p447_p12 = scmp.ne.s32.totalorder %s602_s27, %s446_s4  ;;  %s451_s7 = scalar_lea.hbm %s678_s0, 64 }
  0x12   : > { %p452_p2 = scmp.lt.u32.totalorder %s602_s27, %s678_s0  ;;  %p453_p3 = scmp.lt.u32.totalorder %s451_s7, %s446_s4 }
  0x13   : > { %p449_p0 = pnand %p448_p13, %p447_p12  ;;  %p455_p5 = scmp.lt.u32.totalorder %s446_s4, %s602_s27 }
  0x14   : > { %p454_p4 = por %p453_p3, %p452_p2 }
  0x15   : > { %p450_p1 = pneg %p449_p0 }
  0x16   : > { %p456_p6 = por %p455_p5, %p454_p4 }
  0x18   : > { %p457_p8 = pnand %p456_p6, %p450_p1 }
  0x1a   : > { %460 = shalt.err (!%p457_p8)
}
  0x1b   : > { %s461_s15 = scalar_lea.vmem %s610_s29, 32  ;;  %s528_s17 = smov [#allocation2]  }
  0x1c   : > { %p462_p12 = scmp.ne.s32.totalorder %s610_s29, %s461_s15  ;;  %s466_s18 = sshll.u32 %s528_s17, 4  ;;  %s467_s18 = int_to_ptr.vmem [resolvable:$false] %s466_s18 }
  0x1d   : > { %s468_s19 = scalar_lea.vmem %s467_s18, 64  ;;  %p469_p11 = scmp.lt.s32.totalorder %s610_s29, %s467_s18 }
  0x1e   : > { %p464_p0 = pnand %p462_p12, %p448_p13  ;;  %p470_p2 = scmp.lt.s32.totalorder %s468_s19, %s461_s15 }
  0x20   : > { %p465_p10 = pneg %p464_p0  ;;  %p471_p3 = por %p470_p2, %p469_p11 }
  0x22   : > { %p472_p4 = pnand %p471_p3, %p465_p10 }
  0x24   : > { %475 = shalt.err (!%p472_p4)
}
  0x25   : > { %384 = dma.hbm_to_vmem [thread:$0]  (!%p606_p9), %s602_s27, 32, %s610_s29, %s128_s3  }
  0x26   : > { %p684_p1 = scmp.lt.s32.totalorder %s526_s14, 3  ;;  %p685_p5 = scmp.ge.s32.totalorder %s526_s14, 1 }
  0x28   : > { %p153_p13 = pnand %p685_p5, %p684_p1 }
  0x29   : > { %s158_s22 = sand.u32 (!%p153_p13), 1, %s510_s10  }
  0x2a   : > { %156 = sbr.rel (%p153_p13) target bundleno = 579 (0x243), region = 28  ;;  %s374_s23 = sshll.u32 (!%p153_p13), %s158_s22, 1 }
  0x2b   : > { %s159_s24 = scalar_lea.sflag (!%p153_p13), [#allocation3], %s158_s22  ;;  %s162_s25 = scalar_lea.vmem (!%p153_p13), [#allocation2], %s374_s23 }
  0x31   : > { %501 = dma.done.wait (%p589_p7), %s159_s24, 32  }
  0x32   : > { %503 = vsyncadd (%p589_p7), %s159_s24, 4294967264  ;;  %p187_p10 = scmp.lt.s32.totalorder %s518_s12, 1  ;;  %v213_v0 = vlaneseq  ;;  %vm208_vm0 = vcmask 253952   ;;  %v200_v4 = vld [vmem:[%s162_s25] sm:$0x3]  ;;  %vm203_vm1 = vcmask 254976  }
  0x33   : > { %v202_v6 = vmul.f32 %v200_v4, %v200_v4  ;;  %v529_v12 = vmov 0   ;;  %vm275_vm6 = vcmask 8192   ;;  %vm198_vm7 = vcmask 0  }
  0x34   : > { %s694_s12 = smov (!%p187_p10, %s518_s12), 1  ;;  %v214_v1 = vshrl.u32 %v213_v0, 7  ;;  %436 = vset.pattern.permute.xlu1 %v529_v12  ;;  %437 = vset.pattern.permute.xlu0 %v529_v12  ;;  %v269_v13 = vand.u32 127, %v213_v0  ;;  %v530_v46 = vmov 0.0  }
  0x35   : > { %s189_s28 = scalar_lea.vmem %s679_s1, %s694_s12  ;;  %v204_v10 = vsel %vm203_vm1, %v202_v6, 0.0  ;;  %s193_s30 = scalar_lea.vmem %s680_s2, %s694_s12 }
  0x36   : > { %v215_v2 = vsub.s32 0, %v214_v1  ;;  %v201_v3 = vld [vmem:[%s189_s28] sm:$0x1]  ;;  %v272_v14 = vsub.s32 %v269_v13, %v214_v1  ;;  %199 = vst.msk [vmem:[%s193_s30] sm:$0x1] %vm198_vm7, %v530_v46 }
  0x37   : > { %v207_v5 = vmul.f32 %v201_v3, %v201_v3 }
  0x38   : > { %v216_v7 = vrot.slane %v201_v3, %v215_v2 }
  0x39   : > { %v209_v8 = vsel %vm208_vm0, %v207_v5, 0.0 }
  0x3a   : > { %v218_v9 = vmul.f32 %v216_v7, %v200_v4  ;;  %210 = vadd.xlane.f32.xlu0 %v209_v8 }
  0x3c   : > { %v219_v11 = vsel %vm203_vm1, %v218_v9, 0.0 }
  0x3d   : > { %220 = vadd.xlane.f32.xlu1 %v219_v11  ;;  %v263_v54 = vld [vmem:[%s193_s30] sm:$0x1] }
  0x3e   : > { %205 = vadd.xlane.f32.xlu0 %v204_v10 }
  0xc7   : > { %v211_v15 = vpop.xlane.xlu0 %210 }
  0xc8   : > { %438 = vrsqrt.f32 %v211_v15  ;;  %vm234_vm2 = vcmp.eq.f32.partialorder %v211_v15, inf  ;;  %v237_v19 = vand.u32 2147483648, %v211_v15  ;;  %vm236_vm3 = vcmp.eq.f32.partialorder %v211_v15, 0.0 }
  0xca   : > { %v221_v31 = vpop.xlane.xlu1 %220 }
  0xcb   : > { %v206_v16 = vpop.xlane.xlu0 %205 }
  0xcc   : > { %440 = vrsqrt.f32 %v206_v16  ;;  %vm224_vm4 = vcmp.eq.f32.partialorder %v206_v16, inf  ;;  %v227_v25 = vand.u32 2147483648, %v206_v16  ;;  %vm226_vm5 = vcmp.eq.f32.partialorder %v206_v16, 0.0 }
  0xd2   : > { %v439_v17 = vpop.eup %438 }
  0xd3   : > { %v233_v18 = vmul.f32 %v439_v17, %v211_v15 }
  0xd5   : > { %v235_v20 = vsel %vm234_vm2, %v211_v15, %v233_v18 }
  0xd6   : > { %v441_v21 = vpop.eup %440  ;;  %v238_v22 = vsel %vm236_vm3, %v237_v19, %v235_v20 }
  0xd7   : > { %v239_v23 = vmax.f32 %v238_v22, 1e-12  ;;  %v223_v24 = vmul.f32 %v441_v21, %v206_v16 }
  0xd9   : > { %442 = vrcp.f32 %v239_v23  ;;  %v225_v26 = vsel %vm224_vm4, %v206_v16, %v223_v24 }
  0xda   : > { %v228_v27 = vsel %vm226_vm5, %v227_v25, %v225_v26 }
  0xdb   : > { %v229_v28 = vmax.f32 %v228_v27, 1e-12 }
  0xdd   : > { %444 = vrcp.f32 %v229_v28 }
  0xe3   : > { %v443_v29 = vpop.eup %442 }
  0xe4   : > { %v244_v30 = vmul.f32 %v443_v29, %v211_v15  ;;  %v259_v36 = vrot.slane %v443_v29, %v215_v2 }
  0xe6   : > { %v245_v32 = vmul.f32 %v443_v29, %v244_v30 }
  0xe7   : > { %v445_v33 = vpop.eup %444 }
  0xe8   : > { %v253_v34 = vmul.f32 %v445_v33, %v221_v31  ;;  %v242_v35 = vmul.f32 %v445_v33, %v206_v16  ;;  %v250_v39 = vrot.slane %v245_v32, %v215_v2 }
  0xea   : > { %v254_v37 = vmul.f32 2.0, %v253_v34  ;;  %v243_v38 = vmul.f32 %v445_v33, %v242_v35 }
  0xec   : > { %v261_v40 = vmul.f32 %v259_v36, %v254_v37  ;;  %v252_v41 = vadd.f32 %v250_v39, %v243_v38 }
  0xee   : > { %v262_v42 = vsub.f32 %v252_v41, %v261_v40 }
  0xf0   : > { %266 = vperm.xlu1 %436, %v262_v42  }
 0x16f   : > { %v267_v43 = vpop.permute.xlu1 %266 }
 0x170   : > { %v273_v44 = vrot.slane %v267_v43, %v272_v14 }
 0x172   : > { %v276_v45 = vsel %vm275_vm6, %v273_v44, 0.0 }
 0x173   : > { %277 = vadd.xlane.f32.xlu0 %v276_v45 }
 0x200   : > { %v278_v47 = vpop.xlane.xlu0 %277 }
 0x201   : > { %v279_v48 = vrot.slane %v278_v47, 4 }
 0x203   : > { %v280_v49 = vadd.f32 %v279_v48, %v278_v47 }
 0x205   : > { %v281_v50 = vrot.slane %v280_v49, 2 }
 0x207   : > { %v282_v51 = vadd.f32 %v281_v50, %v280_v49 }
 0x209   : > { %v283_v52 = vrot.slane %v282_v51, 1 }
 0x20b   : > { %v284_v53 = vadd.f32 %v283_v52, %v282_v51 }
 0x20d   : > { %377 = vpush %v284_v53 }
 0x23e   : > { %s378_s3 = spop %377 }
 0x23f   : > { %v286_v55 = vstv %s378_s3 }
 0x240   : > { %v287_v56 = vadd.f32 %v286_v55, %v263_v54 }
 0x242   : > { %289 = vst.msk [vmem:[%s193_s30] sm:$0x1] %vm198_vm7, %v287_v56 }
 0x243 PF: > { %s15_s14 = sadd.s32 1, %s526_s14   ;;  %s686_s9 = smov %s510_s10 }
 0x244   : > { %p12_p7 = scmp.ge.s32.totalorder %s15_s14, 4   ;;  %s687_s10 = smov %s514_s11 }
 0x245   : > { %s688_s11 = smov %s595_s21  ;;  %s689_s12 = smov %s522_s13 }
 0x246   : > { %s690_s13 = smov %s692_s16  ;;  %14 = sbr.rel (!%p12_p7) target bundleno = 4 (0x4), region = 75 }
 0x24d   :  { %307 = vsyncpa [#allocation3], 1 }
 0x24e   :  { %309 = vsyncpa [#allocation3 + $0x1], 1 }

</bundles_post_ra>
